<compile_context>
chip_gen: v5e
topology: v5e:2x2
jax: 0.10.0
libtpu: 0.0.40
codegen_flags: <defaults>
</compile_context>

<pallas_src>
import jax
import jax.numpy as jnp
from jax.experimental import pallas as pl
from jax.experimental.pallas import tpu as pltpu


def _round_up(x, m):
    return ((x + m - 1) // m) * m


# --------------------------------------------------------------------------
# Fused decoder kernel: one (M-tile, 2H) hidden matmul block + merged head.
# --------------------------------------------------------------------------
def _decoder_kernel(tx_ref, w_ref, r_ref, v_ref,
                    wtx_ref, ww_ref, wr_ref, wv_ref, bh_ref,
                    whead_ref, bhead_ref,
                    o_ref):
    f32 = jnp.float32

    # fused first layers of decoder1/decoder2: h = [h1 | h2]  (TM, 2H)
    # (embedding Linears are pre-composed into wtx / bh; Dropout(0.3) = eval identity)
    h = (jnp.dot(tx_ref[...], wtx_ref[...], preferred_element_type=f32)
         + jnp.dot(w_ref[...], ww_ref[...], preferred_element_type=f32)
         + jnp.dot(r_ref[...], wr_ref[...], preferred_element_type=f32)
         + jnp.dot(v_ref[...], wv_ref[...], preferred_element_type=f32)
         + bh_ref[...])
    h = jnp.maximum(h, 0.0).astype(whead_ref.dtype)            # ReLU

    # merged head: lane 0 = mu (decoder1), lane 1 = log_sigma (decoder2)
    head = jnp.dot(h, whead_ref[...], preferred_element_type=f32) + bhead_ref[...]
    sigma = 0.1 + 0.9 * jax.nn.softplus(head)
    col = jax.lax.broadcasted_iota(jnp.int32, head.shape, 1)
    o_ref[...] = jnp.where(col == 0, head, sigma)               # (TM, 2) f32


# --------------------------------------------------------------------------
# One-time parameter preparation (PyTorch-layout weights -> fused block weights).
# --------------------------------------------------------------------------
def prepare_decoder_params(p, x_size, num_hidden, matmul_dtype=jnp.bfloat16):
    H = num_hidden
    Hq, Hh = H // 4, H // 2
    f32 = jnp.float32

    # fused embedding: z_tx = tx @ W_emb + b_emb with z_tx = [t_x | s_x]
    W_emb = jnp.zeros((x_size + 2, Hh), f32)
    W_emb = W_emb.at[2:, 0:Hq].set(p["dec_attr_w"].astype(f32))     # attr -> t_x
    W_emb = W_emb.at[0:2, Hq:Hh].set(p["dec_loc_w"].astype(f32))    # loc  -> s_x
    b_emb = jnp.concatenate([p["dec_attr_b"], p["dec_loc_b"]]).astype(f32)   # (Hh,)

    w11 = p["dec1_w1"].astype(f32)    # (2H + Hh, H), row order: [w | z_tx | r]
    w21 = p["dec2_w1"].astype(f32)    # (H + Hh, H),  row order: [z_tx | v]

    zHH = jnp.zeros((H, H), f32)
    W_w = jnp.concatenate([w11[0:H], zHH], axis=1)                   # (H,  2H) -> h1 only
    W_r = jnp.concatenate([w11[H + Hh:], zHH], axis=1)               # (H,  2H) -> h1 only
    W_v = jnp.concatenate([zHH, w21[Hh:]], axis=1)                   # (H,  2H) -> h2 only
    W_z = jnp.concatenate([w11[H:H + Hh], w21[0:Hh]], axis=1)        # (Hh, 2H) -> both
    b_h = jnp.concatenate([p["dec1_b1"], p["dec2_b1"]]).astype(f32)  # (2H,)

    # compose embedding Linear into the z_tx path (exact: Linear . concat . Linear)
    W_tx = W_emb @ W_z                                               # (x_size+2, 2H)
    b_h = b_h + b_emb @ W_z                                          # (2H,)

    zc = jnp.zeros((H, 1), f32)
    W_head = jnp.concatenate(
        [jnp.concatenate([p["dec1_w2"].astype(f32), zc], axis=1),
         jnp.concatenate([zc, p["dec2_w2"].astype(f32)], axis=1)], axis=0)   # (2H, 2)
    b_head = jnp.concatenate([p["dec1_b2"], p["dec2_b2"]]).astype(f32)       # (2,)

    md = matmul_dtype
    return {
        "w_tx": W_tx.astype(md), "w_w": W_w.astype(md),
        "w_r": W_r.astype(md), "w_v": W_v.astype(md),
        "b_h": b_h.reshape(1, 2 * H),
        "w_head": W_head.astype(md),
        "b_head": b_head.reshape(1, 2),
    }


# --------------------------------------------------------------------------
# Wrapper: flatten batch rows, pad to the row tile, 1-D parallel grid.
# --------------------------------------------------------------------------
def decoder_forward(kp, target_x, r, w, v, *, block_rows=1024):
    B, nt, xf = target_x.shape
    H = r.shape[-1]
    M = B * nt
    md = kp["w_w"].dtype

    # row tile: multiple of 16 (bf16 sublane packing), capped for small inputs
    TM = min(block_rows, _round_up(M, 16))
    M_pad = _round_up(M, TM)
    grid = (M_pad // TM,)

    def flat(a, d):
        # TODO(synk): ideally the upstream producer already emits bf16 to avoid this cast.
        a = a.reshape(M, d).astype(md)
        if M_pad != M:
            a = jnp.pad(a, ((0, M_pad - M), (0, 0)))
        return a

    tx = flat(target_x, xf)
    wf = flat(w, H)
    rf = flat(r, H)
    vf = flat(v, H)

    row_spec = lambda d: pl.BlockSpec((TM, d), lambda i: (i, 0))
    const_spec = lambda a: pl.BlockSpec(a.shape, lambda i: (0, 0))   # VMEM-resident weights

    out = pl.pallas_call(
        _decoder_kernel,
        out_shape=jax.ShapeDtypeStruct((M_pad, 2), jnp.float32),
        grid=grid,
        in_specs=[row_spec(xf), row_spec(H), row_spec(H), row_spec(H),
                  const_spec(kp["w_tx"]), const_spec(kp["w_w"]),
                  const_spec(kp["w_r"]), const_spec(kp["w_v"]),
                  const_spec(kp["b_h"]),
                  const_spec(kp["w_head"]), const_spec(kp["b_head"])],
        out_specs=row_spec(2),
        compiler_params=pltpu.CompilerParams(
            dimension_semantics=("parallel",),
            vmem_limit_bytes=32 * 1024 * 1024),
    )(tx, wf, rf, vf,
      kp["w_tx"], kp["w_w"], kp["w_r"], kp["w_v"], kp["b_h"],
      kp["w_head"], kp["b_head"])

    out = out[:M].reshape(B, nt, 2)
    return out[..., 0], out[..., 1]       # mu, sigma


# --------------------------------------------------------------------------
# Pure-JAX reference of the PyTorch forward (for correctness check)
# --------------------------------------------------------------------------
def decoder_reference(p, target_x, r, w, v):
    t_x = target_x[..., 2:] @ p["dec_attr_w"] + p["dec_attr_b"]
    s_x = target_x[..., 0:2] @ p["dec_loc_w"] + p["dec_loc_b"]
    z_tx = jnp.concatenate([t_x, s_x], axis=-1)
    z1 = jnp.concatenate([w, z_tx, r], axis=-1)
    h1 = jax.nn.relu(z1 @ p["dec1_w1"] + p["dec1_b1"])
    mu = (h1 @ p["dec1_w2"] + p["dec1_b2"])[..., 0]
    z2 = jnp.concatenate([z_tx, v], axis=-1)
    h2 = jax.nn.relu(z2 @ p["dec2_w1"] + p["dec2_b1"])
    log_sigma = (h2 @ p["dec2_w2"] + p["dec2_b2"])[..., 0]
    sigma = 0.1 + 0.9 * jax.nn.softplus(log_sigma)
    return mu, sigma


# --------------------------------------------------------------------------
# Deterministic synthetic parameter init (PyTorch layout: full concat weights)
# --------------------------------------------------------------------------
def init_params(key, x_size, num_hidden):
    H = num_hidden
    Hq = H // 4
    keys = iter(jax.random.split(key, 16))

    def dense(din, dout):
        k = next(keys)
        wgt = jax.random.normal(k, (din, dout), jnp.float32) / jnp.sqrt(jnp.float32(din))
        bias = jax.random.normal(next(keys), (dout,), jnp.float32) * 0.05
        return wgt, bias

    p = {}
    p["dec_attr_w"], p["dec_attr_b"] = dense(x_size, Hq)
    p["dec_loc_w"], p["dec_loc_b"] = dense(2, Hq)
    p["dec1_w1"], p["dec1_b1"] = dense(2 * H + H // 2, H)
    p["dec1_w2"], p["dec1_b2"] = dense(H, 1)
    p["dec2_w1"], p["dec2_b1"] = dense(H + H // 2, H)
    p["dec2_w2"], p["dec2_b2"] = dense(H, 1)
    return p


if __name__ == "__main__":
    x_size, y_size, num_hidden = 4, 1, 32
    bs, n_target = 2, 8

    key = jax.random.PRNGKey(0)
    kt, kr, kw, kv, kp = jax.random.split(key, 5)
    # target_x features = [loc0, loc1, attr_0 .. attr_{x_size-1}]
    target_x = jax.random.normal(kt, (bs, n_target, x_size + 2), jnp.float32)
    r = jax.random.normal(kr, (bs, n_target, num_hidden), jnp.float32)
    w = jax.random.normal(kw, (bs, n_target, num_hidden), jnp.float32)
    v = jax.random.normal(kv, (bs, n_target, num_hidden), jnp.float32)

    params = init_params(kp, x_size, num_hidden)
    kparams = prepare_decoder_params(params, x_size, num_hidden)  # one-time weight fusion

    fwd = jax.jit(decoder_forward)
    mu, sigma = fwd(kparams, target_x, r, w, v)
    jax.block_until_ready((mu, sigma))

    mu_ref, sigma_ref = decoder_reference(params, target_x, r, w, v)

    assert mu.shape == (bs, n_target) and sigma.shape == (bs, n_target)
    assert bool(jnp.all(jnp.isfinite(mu))) and bool(jnp.all(sigma > 0.1))
    assert bool(jnp.allclose(mu, mu_ref, atol=5e-2, rtol=5e-2)), "mu mismatch vs reference"
    assert bool(jnp.allclose(sigma, sigma_ref, atol=5e-2, rtol=5e-2)), "sigma mismatch vs reference"
    print("KERNEL_OK")
</pallas_src>

<mosaic_0001>
module attributes {stable_mosaic.version = 11 : i64} {
  func.func @_decoder_kernel(%arg0: i32, %arg1: memref<16x6xbf16, #tpu.memory_space<vmem>>, %arg2: memref<16x32xbf16, #tpu.memory_space<vmem>>, %arg3: memref<16x32xbf16, #tpu.memory_space<vmem>>, %arg4: memref<16x32xbf16, #tpu.memory_space<vmem>>, %arg5: memref<6x64xbf16, #tpu.memory_space<vmem>>, %arg6: memref<32x64xbf16, #tpu.memory_space<vmem>>, %arg7: memref<32x64xbf16, #tpu.memory_space<vmem>>, %arg8: memref<32x64xbf16, #tpu.memory_space<vmem>>, %arg9: memref<1x64xf32, #tpu.memory_space<vmem>>, %arg10: memref<64x2xbf16, #tpu.memory_space<vmem>>, %arg11: memref<1x2xf32, #tpu.memory_space<vmem>>, %arg12: memref<16x2xf32, #tpu.memory_space<vmem>>) attributes {dimension_semantics = [#tpu.dimension_semantics<parallel>], iteration_bounds = array<i64: 1>, scalar_prefetch = 0 : i64, scratch_operands = 0 : i64, tpu.core_type = #tpu.core_type<tc>, window_params = [{transform_indices = @transform_0, window_bounds = array<i64: 16, 6>}, {transform_indices = @transform_1, window_bounds = array<i64: 16, 32>}, {transform_indices = @transform_2, window_bounds = array<i64: 16, 32>}, {transform_indices = @transform_3, window_bounds = array<i64: 16, 32>}, {pipeline_mode = #tpu.pipeline_mode<synchronous>, transform_indices = @transform_4, window_bounds = array<i64: 6, 64>}, {pipeline_mode = #tpu.pipeline_mode<synchronous>, transform_indices = @transform_5, window_bounds = array<i64: 32, 64>}, {pipeline_mode = #tpu.pipeline_mode<synchronous>, transform_indices = @transform_6, window_bounds = array<i64: 32, 64>}, {pipeline_mode = #tpu.pipeline_mode<synchronous>, transform_indices = @transform_7, window_bounds = array<i64: 32, 64>}, {pipeline_mode = #tpu.pipeline_mode<synchronous>, transform_indices = @transform_8, window_bounds = array<i64: 1, 64>}, {pipeline_mode = #tpu.pipeline_mode<synchronous>, transform_indices = @transform_9, window_bounds = array<i64: 64, 2>}, {pipeline_mode = #tpu.pipeline_mode<synchronous>, transform_indices = @transform_10, window_bounds = array<i64: 1, 2>}, {transform_indices = @transform_11, window_bounds = array<i64: 16, 2>}]} {
    %c0 = arith.constant 0 : index
    %c0_0 = arith.constant 0 : index
    %0 = vector.load %arg1[%c0, %c0_0] : memref<16x6xbf16, #tpu.memory_space<vmem>>, vector<16x6xbf16>
    %c0_1 = arith.constant 0 : index
    %c0_2 = arith.constant 0 : index
    %1 = vector.load %arg5[%c0_1, %c0_2] : memref<6x64xbf16, #tpu.memory_space<vmem>>, vector<6x64xbf16>
    %cst = arith.constant dense<0.000000e+00> : vector<16x64xf32>
    %2 = tpu.matmul %0, %1, %cst {dimension_numbers = #tpu.dot_dimension_numbers<[1], [0], [0], [1], [0, 0, 1, 1], [], []>} : vector<16x6xbf16>, vector<6x64xbf16>, vector<16x64xf32> -> vector<16x64xf32>
    %c0_3 = arith.constant 0 : index
    %c0_4 = arith.constant 0 : index
    %3 = vector.load %arg2[%c0_3, %c0_4] : memref<16x32xbf16, #tpu.memory_space<vmem>>, vector<16x32xbf16>
    %c0_5 = arith.constant 0 : index
    %c0_6 = arith.constant 0 : index
    %4 = vector.load %arg6[%c0_5, %c0_6] : memref<32x64xbf16, #tpu.memory_space<vmem>>, vector<32x64xbf16>
    %cst_7 = arith.constant dense<0.000000e+00> : vector<16x64xf32>
    %5 = tpu.matmul %3, %4, %cst_7 {dimension_numbers = #tpu.dot_dimension_numbers<[1], [0], [0], [1], [0, 0, 1, 1], [], []>} : vector<16x32xbf16>, vector<32x64xbf16>, vector<16x64xf32> -> vector<16x64xf32>
    %6 = arith.addf %2, %5 : vector<16x64xf32>
    %c0_8 = arith.constant 0 : index
    %c0_9 = arith.constant 0 : index
    %7 = vector.load %arg3[%c0_8, %c0_9] : memref<16x32xbf16, #tpu.memory_space<vmem>>, vector<16x32xbf16>
    %c0_10 = arith.constant 0 : index
    %c0_11 = arith.constant 0 : index
    %8 = vector.load %arg7[%c0_10, %c0_11] : memref<32x64xbf16, #tpu.memory_space<vmem>>, vector<32x64xbf16>
    %cst_12 = arith.constant dense<0.000000e+00> : vector<16x64xf32>
    %9 = tpu.matmul %7, %8, %cst_12 {dimension_numbers = #tpu.dot_dimension_numbers<[1], [0], [0], [1], [0, 0, 1, 1], [], []>} : vector<16x32xbf16>, vector<32x64xbf16>, vector<16x64xf32> -> vector<16x64xf32>
    %10 = arith.addf %6, %9 : vector<16x64xf32>
    %c0_13 = arith.constant 0 : index
    %c0_14 = arith.constant 0 : index
    %11 = vector.load %arg4[%c0_13, %c0_14] : memref<16x32xbf16, #tpu.memory_space<vmem>>, vector<16x32xbf16>
    %c0_15 = arith.constant 0 : index
    %c0_16 = arith.constant 0 : index
    %12 = vector.load %arg8[%c0_15, %c0_16] : memref<32x64xbf16, #tpu.memory_space<vmem>>, vector<32x64xbf16>
    %cst_17 = arith.constant dense<0.000000e+00> : vector<16x64xf32>
    %13 = tpu.matmul %11, %12, %cst_17 {dimension_numbers = #tpu.dot_dimension_numbers<[1], [0], [0], [1], [0, 0, 1, 1], [], []>} : vector<16x32xbf16>, vector<32x64xbf16>, vector<16x64xf32> -> vector<16x64xf32>
    %14 = arith.addf %10, %13 : vector<16x64xf32>
    %c0_18 = arith.constant 0 : index
    %c0_19 = arith.constant 0 : index
    %15 = vector.load %arg9[%c0_18, %c0_19] : memref<1x64xf32, #tpu.memory_space<vmem>>, vector<1x64xf32>
    %16 = vector.broadcast %15 : vector<1x64xf32> to vector<16x64xf32>
    %17 = arith.addf %14, %16 : vector<16x64xf32>
    %cst_20 = arith.constant 0.000000e+00 : f32
    %18 = vector.broadcast %cst_20 : f32 to vector<16x64xf32>
    %19 = arith.maximumf %17, %18 : vector<16x64xf32>
    %20 = arith.truncf %19 : vector<16x64xf32> to vector<16x64xbf16>
    %c0_21 = arith.constant 0 : index
    %c0_22 = arith.constant 0 : index
    %21 = vector.load %arg10[%c0_21, %c0_22] : memref<64x2xbf16, #tpu.memory_space<vmem>>, vector<64x2xbf16>
    %cst_23 = arith.constant dense<0.000000e+00> : vector<16x2xf32>
    %22 = tpu.matmul %20, %21, %cst_23 {dimension_numbers = #tpu.dot_dimension_numbers<[1], [0], [0], [1], [0, 0, 1, 1], [], []>} : vector<16x64xbf16>, vector<64x2xbf16>, vector<16x2xf32> -> vector<16x2xf32>
    %c0_24 = arith.constant 0 : index
    %c0_25 = arith.constant 0 : index
    %23 = vector.load %arg11[%c0_24, %c0_25] : memref<1x2xf32, #tpu.memory_space<vmem>>, vector<1x2xf32>
    %24 = vector.broadcast %23 : vector<1x2xf32> to vector<16x2xf32>
    %25 = arith.addf %22, %24 : vector<16x2xf32>
    %cst_26 = arith.constant 0.000000e+00 : f32
    %26 = vector.broadcast %cst_26 : f32 to vector<16x2xf32>
    %27 = arith.maximumf %25, %26 : vector<16x2xf32>
    %28 = vector.broadcast %cst_26 : f32 to vector<16x2xf32>
    %29 = arith.subf %25, %28 : vector<16x2xf32>
    %30 = arith.cmpf one, %29, %29 : vector<16x2xf32>
    %31 = vector.broadcast %cst_26 : f32 to vector<16x2xf32>
    %32 = arith.addf %25, %31 : vector<16x2xf32>
    %33 = math.absf %29 : vector<16x2xf32>
    %cst_27 = arith.constant 0.000000e+00 : f32
    %34 = vector.broadcast %cst_27 : f32 to vector<16x2xf32>
    %35 = arith.subf %34, %33 : vector<16x2xf32>
    %36 = math.exp %35 : vector<16x2xf32>
    %37 = math.log1p %36 : vector<16x2xf32>
    %38 = arith.addf %27, %37 : vector<16x2xf32>
    %39 = arith.select %30, %32, %38 : vector<16x2xi1>, vector<16x2xf32>
    %cst_28 = arith.constant 0.899999976 : f32
    %40 = vector.broadcast %cst_28 : f32 to vector<16x2xf32>
    %41 = arith.mulf %40, %39 : vector<16x2xf32>
    %cst_29 = arith.constant 1.000000e-01 : f32
    %42 = vector.broadcast %cst_29 : f32 to vector<16x2xf32>
    %43 = arith.addf %42, %41 : vector<16x2xf32>
    %44 = tpu.iota {dimensions = array<i32: 1>} : vector<16x2xi32>
    %c0_i32 = arith.constant 0 : i32
    %45 = vector.broadcast %c0_i32 : i32 to vector<16x2xi32>
    %46 = arith.cmpi eq, %44, %45 : vector<16x2xi32>
    %47 = arith.select %46, %25, %43 : vector<16x2xi1>, vector<16x2xf32>
    %c0_30 = arith.constant 0 : index
    %c0_31 = arith.constant 0 : index
    %48 = vector.load %arg12[%c0_30, %c0_31] : memref<16x2xf32, #tpu.memory_space<vmem>>, vector<16x2xf32>
    tpu.vector_store %arg12[%c0_30, %c0_31], %47 {strides = array<i32>} : memref<16x2xf32, #tpu.memory_space<vmem>>, vector<16x2xf32>,
    return
  }
  func.func @transform_0(%arg0: i32) -> (i32, i32) {
    %c0_i32 = arith.constant 0 : i32
    %c0_i32_0 = arith.constant 0 : i32
    return %arg0, %c0_i32 : i32, i32
  }
  func.func @transform_1(%arg0: i32) -> (i32, i32) {
    %c0_i32 = arith.constant 0 : i32
    %c0_i32_0 = arith.constant 0 : i32
    return %arg0, %c0_i32 : i32, i32
  }
  func.func @transform_2(%arg0: i32) -> (i32, i32) {
    %c0_i32 = arith.constant 0 : i32
    %c0_i32_0 = arith.constant 0 : i32
    return %arg0, %c0_i32 : i32, i32
  }
  func.func @transform_3(%arg0: i32) -> (i32, i32) {
    %c0_i32 = arith.constant 0 : i32
    %c0_i32_0 = arith.constant 0 : i32
    return %arg0, %c0_i32 : i32, i32
  }
  func.func @transform_4(%arg0: i32) -> (i32, i32) {
    %c0_i32 = arith.constant 0 : i32
    %c0_i32_0 = arith.constant 0 : i32
    %c0_i32_1 = arith.constant 0 : i32
    return %c0_i32, %c0_i32_0 : i32, i32
  }
  func.func @transform_5(%arg0: i32) -> (i32, i32) {
    %c0_i32 = arith.constant 0 : i32
    %c0_i32_0 = arith.constant 0 : i32
    %c0_i32_1 = arith.constant 0 : i32
    return %c0_i32, %c0_i32_0 : i32, i32
  }
  func.func @transform_6(%arg0: i32) -> (i32, i32) {
    %c0_i32 = arith.constant 0 : i32
    %c0_i32_0 = arith.constant 0 : i32
    %c0_i32_1 = arith.constant 0 : i32
    return %c0_i32, %c0_i32_0 : i32, i32
  }
  func.func @transform_7(%arg0: i32) -> (i32, i32) {
    %c0_i32 = arith.constant 0 : i32
    %c0_i32_0 = arith.constant 0 : i32
    %c0_i32_1 = arith.constant 0 : i32
    return %c0_i32, %c0_i32_0 : i32, i32
  }
  func.func @transform_8(%arg0: i32) -> (i32, i32) {
    %c0_i32 = arith.constant 0 : i32
    %c0_i32_0 = arith.constant 0 : i32
    %c0_i32_1 = arith.constant 0 : i32
    return %c0_i32, %c0_i32_0 : i32, i32
  }
  func.func @transform_9(%arg0: i32) -> (i32, i32) {
    %c0_i32 = arith.constant 0 : i32
    %c0_i32_0 = arith.constant 0 : i32
    %c0_i32_1 = arith.constant 0 : i32
    return %c0_i32, %c0_i32_0 : i32, i32
  }
  func.func @transform_10(%arg0: i32) -> (i32, i32) {
    %c0_i32 = arith.constant 0 : i32
    %c0_i32_0 = arith.constant 0 : i32
    %c0_i32_1 = arith.constant 0 : i32
    return %c0_i32, %c0_i32_0 : i32, i32
  }
  func.func @transform_11(%arg0: i32) -> (i32, i32) {
    %c0_i32 = arith.constant 0 : i32
    %c0_i32_0 = arith.constant 0 : i32
    return %arg0, %c0_i32 : i32, i32
  }
}

</mosaic_0001>

<bundles_post_ra>
// kernel: decoder_forward.1
= control target key start
LH: loop header
LB: loop body
LE: loop exit
PB: predicated region body
PF: predicated region fallthrough
CT: control target
= control target key end

     0   :  { %vm92_vm0 = vcmask 1042432   ;;  %vm88_vm1 = vcmask 48128   ;;  %vm65_vm2 = vcmask 261120   ;;  %vm239_vm3 = vcmask 523264   ;;  %s513_s5 = inlined_call_operand.vmem [shape: bf16[32,64], index: 5, kind: input, shape index: {}]   ;;  %s514_s4 = inlined_call_operand.vmem [shape: bf16[6,64], index: 4, kind: input, shape index: {}]   ;;  %s515_s6 = inlined_call_operand.vmem [shape: bf16[32,64], index: 6, kind: input, shape index: {}]   ;;  %s516_s7 = inlined_call_operand.vmem [shape: bf16[32,64], index: 7, kind: input, shape index: {}]   ;;  %s517_s0 = inlined_call_operand.vmem [shape: bf16[16,6], index: 0, kind: input, shape index: {}]   ;;  %s518_s1 = inlined_call_operand.vmem [shape: bf16[16,32], index: 1, kind: input, shape index: {}]   ;;  %s519_s2 = inlined_call_operand.vmem [shape: bf16[16,32], index: 2, kind: input, shape index: {}]   ;;  %s520_s3 = inlined_call_operand.vmem [shape: bf16[16,32], index: 3, kind: input, shape index: {}]   ;;  %s521_s8 = inlined_call_operand.vmem [shape: f32[1,64], index: 8, kind: input, shape index: {}]   ;;  %s522_s10 = inlined_call_operand.vmem [shape: f32[1,2], index: 10, kind: input, shape index: {}]   ;;  %s523_s9 = inlined_call_operand.vmem [shape: bf16[64,2], index: 9, kind: input, shape index: {}]   ;;  %s524_s11 = inlined_call_operand.vmem [shape: f32[16,2], index: 11, kind: output, shape index: {}]  }
   0x1   :  { %v373_v0 = vld [vmem:[%s513_s5 + $0x8] sm:$0xff]  ;;  %v41_v1 = vld [vmem:[%s514_s4] sm:$0x7]  ;;  %v383_v12 = vld [vmem:[%s523_s9 + $0x18] sm:$0xff]  ;;  %v297_v54 = vlaneseq  ;;  %vm302_vm7 = vcmask 15360  }
   0x2   :  { %v376_v2 = vld [vmem:[%s515_s6 + $0x8] sm:$0xff]  ;;  %v94_v3 = vsel %vm92_vm0, %v41_v1, 0  ;;  %v370_v5 = vld [vmem:[%s517_s0] sm:$0xff]  ;;  %75 = vmatpush.bf16.msra.mxu0 %v373_v0  ;;  %v382_v13 = vld [vmem:[%s523_s9 + $0x10] sm:$0xff] }
   0x3   :  { %v379_v4 = vld [vmem:[%s516_s7 + $0x8] sm:$0xff]  ;;  %103 = vmatpush.bf16.msra.mxu1 %v94_v3  ;;  %v372_v6 = vld [vmem:[%s513_s5] sm:$0xff]  ;;  %142 = vmatpush.bf16.msra.mxu2 %v376_v2  ;;  %v298_v62 = vand.u32 127, %v297_v54 }
   0x4   :  { %184 = vmatpush.bf16.msra.mxu3 %v379_v4  ;;  %v375_v7 = vld [vmem:[%s515_s6] sm:$0xff]  ;;  %v381_v14 = vld [vmem:[%s523_s9 + $0x8] sm:$0xff] }
   0x5   :  { %v378_v8 = vld [vmem:[%s516_s7] sm:$0xff]  ;;  %vm299_vm6 = vcmp.eq.s32.totalorder %v298_v62, 0 }
   0x6   :  { %326 = vmatmul.msk.bf16.vlgmr.msra.gmra.mxu1 %vm88_vm1, %v370_v5  ;;  %v371_v9 = vld [vmem:[%s518_s1] sm:$0xff]  ;;  %76 = vmatpush.bf16.msra.mxu0 %v372_v6 }
   0x7   :  { %v374_v10 = vld [vmem:[%s519_s2] sm:$0xff]  ;;  %143 = vmatpush.bf16.msra.mxu2 %v375_v7  ;;  %247 = vmatpush.bf16.msrb.mxu1 %v383_v12 }
   0x8   :  { %v377_v11 = vld [vmem:[%s520_s3] sm:$0xff]  ;;  %185 = vmatpush.bf16.msra.mxu3 %v378_v8 }
   0x9   :  { %321 = vmatmul.msk.bf16.vlgmr.msra.gmra.mxu0 %vm65_vm2, %v371_v9  ;;  %v380_v15 = vld [vmem:[%s523_s9] sm:$0xff] }
   0xa   :  { %339 = vmatmul.msk.bf16.vlgmr.msra.gmra.mxu2 %vm65_vm2, %v374_v10  ;;  %v384_v25 = vld [vmem:[%s521_s8] ss:$0 sm:$0xff] }
   0xb   :  { %352 = vmatmul.msk.bf16.vlgmr.msra.gmra.mxu3 %vm65_vm2, %v377_v11  ;;  %248 = vmatpush.bf16.msrb.mxu1 %v382_v13  ;;  %v385_v36 = vld [vmem:[%s522_s10] ss:$0 sm:$0xff] }
   0xf   :  { %249 = vmatpush.bf16.msrb.mxu1 %v381_v14 }
  0x13   :  { %250 = vmatpush.bf16.msrb.mxu1 %v380_v15 }
  0x83   :  { %v105_v17 = vpop.f32.mrf.mxu1 }
  0x86   :  { %v78_v16 = vpop.f32.mrf.mxu0 }
  0x87   :  { %v106_v18 = vadd.f32 %v105_v17, %v78_v16 }
  0x8b   :  { %v107_v23 = vpop.f32.mrf.mxu1 }
  0x8d   :  { %v145_v19 = vpop.f32.mrf.mxu2 }
  0x8e   :  { %v187_v20 = vpop.f32.mrf.mxu3  ;;  %v150_v21 = vadd.f32 %v145_v19, %v106_v18  ;;  %v80_v22 = vpop.f32.mrf.mxu0 }
  0x8f   :  { %v108_v26 = vadd.f32 %v107_v23, %v80_v22 }
  0x90   :  { %v192_v24 = vadd.f32 %v187_v20, %v150_v21 }
  0x92   :  { %v198_v30 = vadd.f32 %v384_v25, %v192_v24 }
  0x94   :  { %v200_v33 = vmax.f32 %v198_v30, 0.0 }
  0x95   :  { %v147_v27 = vpop.f32.mrf.mxu2 }
  0x96   :  { %v151_v28 = vadd.f32 %v147_v27, %v108_v26  ;;  %v189_v29 = vpop.f32.mrf.mxu3 }
  0x98   :  { %v193_v31 = vadd.f32 %v189_v29, %v151_v28 }
  0x9a   :  { %v199_v32 = vadd.f32 %v384_v25, %v193_v31 }
  0x9c   :  { %v201_v34 = vmax.f32 %v199_v32, 0.0 }
  0x9e   :  { %v202_v35 = vpack.c.bf16 %v201_v34, %v200_v33 }
  0xa0   :  { %369 = vmatmul.msk.bf16.vlgmr.msrb.gmra.mxu1 %vm239_vm3, %v202_v35 }
 0x11d   :  { %v252_v37 = vpop.f32.mrf.mxu1 }
 0x11e   :  { %v253_v38 = vadd.f32 %v385_v36, %v252_v37 }
 0x120   :  { %v263_v39 = vand.u32 2147483647, %v253_v38  ;;  %v257_v59 = vmax.f32 %v253_v38, 0.0  ;;  %vm259_vm5 = vcmp.ne.f32.partialorder %v253_v38, %v253_v38 }
 0x122   :  { %v265_v40 = vsub.f32 0.0, %v263_v39 }
 0x124   :  { %v267_v41 = vmul.f32 1.442695, %v265_v40 }
 0x125   :  { %v254_v42 = vpop.f32.mrf.mxu1 }
 0x126   :  { %386 = vpow2.f32 %v267_v41  ;;  %v255_v43 = vadd.f32 %v385_v36, %v254_v42 }
 0x128   :  { %v264_v44 = vand.u32 2147483647, %v255_v43  ;;  %v258_v7 = vmax.f32 %v255_v43, 0.0  ;;  %vm260_vm9 = vcmp.ne.f32.partialorder %v255_v43, %v255_v43 }
 0x12a   :  { %v266_v45 = vsub.f32 0.0, %v264_v44 }
 0x12c   :  { %v387_v46 = vpop.eup %386  ;;  %v269_v47 = vmul.f32 1.442695, %v266_v45 }
 0x12d   :  { %v271_v48 = vadd.f32 1.0, %v387_v46  ;;  %v274_v49 = vmul.f32 -0.5, %v387_v46  ;;  %v277_v51 = vand.u32 2147483647, %v387_v46 }
 0x12e   :  { %388 = vpow2.f32 %v269_v47 }
 0x12f   :  { %390 = vlog2.f32 %v271_v48  ;;  %v275_v50 = vadd.f32 1.0, %v274_v49  ;;  %vm278_vm4 = vcmp.lt.f32.partialorder %v277_v51, 0.0004427343 }
 0x131   :  { %v276_v57 = vmul.f32 %v387_v46, %v275_v50 }
 0x134   :  { %v389_v52 = vpop.eup %388 }
 0x135   :  { %v391_v53 = vpop.eup %390  ;;  %v280_v55 = vadd.f32 1.0, %v389_v52  ;;  %v283_v58 = vmul.f32 -0.5, %v389_v52  ;;  %v286_v1 = vand.u32 2147483647, %v389_v52 }
 0x136   :  { %v273_v56 = vmul.f32 0.6931472, %v391_v53 }
 0x137   :  { %392 = vlog2.f32 %v280_v55  ;;  %v284_v63 = vadd.f32 1.0, %v283_v58  ;;  %vm287_vm8 = vcmp.lt.f32.partialorder %v286_v1, 0.0004427343 }
 0x138   :  { %v279_v60 = vsel %vm278_vm4, %v276_v57, %v273_v56 }
 0x139   :  { %v289_v61 = vadd.f32 %v279_v60, %v257_v59  ;;  %v285_v6 = vmul.f32 %v389_v52, %v284_v63 }
 0x13b   :  { %v291_v0 = vsel %vm259_vm5, %v253_v38, %v289_v61 }
 0x13c   :  { %v293_v2 = vmul.f32 0.9, %v291_v0 }
 0x13d   :  { %v393_v3 = vpop.eup %392 }
 0x13e   :  { %v295_v4 = vadd.f32 0.1, %v293_v2  ;;  %v282_v5 = vmul.f32 0.6931472, %v393_v3 }
 0x140   :  { %v300_v8 = vsel %vm299_vm6, %v253_v38, %v295_v4  ;;  %v288_v9 = vsel %vm287_vm8, %v285_v6, %v282_v5 }
 0x141   :  { %303 = vst.msk [vmem:[%s524_s11] sm:$0xff] %vm302_vm7, %v300_v8  ;;  %v290_v10 = vadd.f32 %v288_v9, %v258_v7 }
 0x143   :  { %v292_v11 = vsel %vm260_vm9, %v255_v43, %v290_v10 }
 0x144   :  { %v294_v12 = vmul.f32 0.9, %v292_v11 }
 0x146   :  { %v296_v13 = vadd.f32 0.1, %v294_v12 }
 0x148   :  { %v301_v14 = vsel %vm299_vm6, %v255_v43, %v296_v13 }
 0x149   :  { %304 = vst.msk [vmem:[%s524_s11 + $0x8] sm:$0xff] %vm302_vm7, %v301_v14 }

</bundles_post_ra>
